<compile_context>
chip_gen: v5e
topology: v5e:2x2
jax: 0.10.0
libtpu: 0.0.40
codegen_flags: <defaults>
</compile_context>

<pallas_src>
import functools

import jax
import jax.numpy as jnp
from jax.experimental import pallas as pl
from jax.experimental.pallas import tpu as pltpu


def _round_up(x, m):
    return (x + m - 1) // m * m


# ---------------------------------------------------------------------------
# Hardware / feature probes (cached; cheap, run once).
# ---------------------------------------------------------------------------
@functools.cache
def _vmem_capacity_bytes():
    """Per-TensorCore VMEM capacity; conservative 64 MiB if query fails."""
    try:
        info = pltpu.get_tpu_info()
        cap = int(info.vmem_capacity_bytes)
        if cap > 0:
            return cap
    except Exception:
        pass
    return 64 << 20


def _probe_copy_kernel(a_ref, o_ref):
    o_ref[...] = a_ref[...]


@functools.cache
def _single_buffered_weights_supported():
    """Probe pipeline_mode=pl.Buffered(1) on a resident (constant-index) input."""
    try:
        x = jnp.zeros((8, 128), jnp.float32)
        fn = pl.pallas_call(
            _probe_copy_kernel,
            out_shape=jax.ShapeDtypeStruct((8, 128), jnp.float32),
            grid=(2,),
            in_specs=[pl.BlockSpec((8, 128), lambda i: (0, 0),
                                   pipeline_mode=pl.Buffered(1))],
            out_specs=pl.BlockSpec((8, 128), lambda i: (0, 0)),
        )
        jax.block_until_ready(fn(x))
        return True
    except Exception:
        return False


def _pick_tm(batch, *, max_tm, prefer_two_steps):
    """Pick the batch tile TM minimizing padding + per-grid-step overhead."""
    b8 = _round_up(max(batch, 1), 8)
    candidates = [t for t in (512, 256, 128, 64, 32, 16, 8) if t <= max_tm]
    best = None
    for tm in candidates:
        bp = _round_up(b8, tm)
        steps = bp // tm
        # padded rows + ~32-row-equivalent per-step overhead (+ dual-TC bonus)
        score = bp + 32 * steps
        if prefer_two_steps and steps < 2:
            score += 64
        key = (score, -tm)
        if best is None or key < best[0]:
            best = (key, tm, bp)
    return best[1], best[2]


# ---------------------------------------------------------------------------
# Kernels.
# ---------------------------------------------------------------------------
def _mlp_kernel_resident(x_ref, w1_ref, b1_ref, w2_ref, b2_ref, w3_ref, b3_ref,
                         o_ref):
    """All weights VMEM-resident; one batch tile per grid step."""
    x = x_ref[...]
    h1 = jnp.dot(x, w1_ref[...], preferred_element_type=jnp.float32) + b1_ref[...]
    h1 = jnp.maximum(h1, 0.0).astype(w2_ref.dtype)
    h2 = jnp.dot(h1, w2_ref[...], preferred_element_type=jnp.float32) + b2_ref[...]
    h2 = jnp.maximum(h2, 0.0).astype(w3_ref.dtype)
    out = jnp.dot(h2, w3_ref[...], preferred_element_type=jnp.float32) + b3_ref[...]
    o_ref[...] = out.astype(o_ref.dtype)


def _mlp_kernel_tiled(x_ref, w1_ref, b1_ref, w2_ref, b2_ref, w3_ref, b3_ref,
                      o_ref, h1_scr, acc_scr):
    """Fallback for weights too large for VMEM: grid=(batch, H2 tiles).

    w2 columns / w3 rows are streamed along the last ("arbitrary") grid axis;
    h1 is computed once per batch tile and kept in VMEM scratch; the partial
    third-matmul results accumulate into an f32 scratch accumulator.
    """
    j = pl.program_id(1)

    @pl.when(j == 0)
    def _():
        h1 = jnp.dot(x_ref[...], w1_ref[...],
                     preferred_element_type=jnp.float32) + b1_ref[...]
        h1_scr[...] = jnp.maximum(h1, 0.0)
        acc_scr[...] = jnp.zeros_like(acc_scr)

    h1 = h1_scr[...].astype(w2_ref.dtype)
    h2 = jnp.dot(h1, w2_ref[...], preferred_element_type=jnp.float32) + b2_ref[...]
    h2 = jnp.maximum(h2, 0.0).astype(w3_ref.dtype)
    acc_scr[...] += jnp.dot(h2, w3_ref[...], preferred_element_type=jnp.float32)

    @pl.when(j == pl.num_programs(1) - 1)
    def _():
        o_ref[...] = (acc_scr[...] + b3_ref[...]).astype(o_ref.dtype)


# ---------------------------------------------------------------------------
# Parameter preparation (padding/casting hoisted out of the per-call path).
# ---------------------------------------------------------------------------
def prepare_mlp_params(w1, b1, w2, b2, w3, b3, *, compute_dtype=jnp.bfloat16):
    """Pad feature dims to multiples of 128 and cast weights to compute_dtype.

    Biases stay f32 (added after f32 accumulation). Zero padding is exact
    through the Linear -> ReLU -> Linear chain. Call once; reuse per forward.
    """
    def as_2d_bias(b):
        return jnp.asarray(b).reshape(1, -1)

    b1, b2, b3 = as_2d_bias(b1), as_2d_bias(b2), as_2d_bias(b3)
    d_in, h1 = w1.shape
    h2 = w2.shape[1]
    d_out = w3.shape[1]
    assert w2.shape[0] == h1 and w3.shape[0] == h2
    assert b1.shape[1] == h1 and b2.shape[1] == h2 and b3.shape[1] == d_out

    d_in_p, h1_p, h2_p, d_out_p = (_round_up(d, 128) for d in (d_in, h1, h2, d_out))

    def pad2(a, rows, cols, dt):
        a = jnp.asarray(a).astype(dt)
        return jnp.pad(a, ((0, rows - a.shape[0]), (0, cols - a.shape[1])))

    return {
        "w1": pad2(w1, d_in_p, h1_p, compute_dtype),
        "b1": pad2(b1, 1, h1_p, jnp.float32),
        "w2": pad2(w2, h1_p, h2_p, compute_dtype),
        "b2": pad2(b2, 1, h2_p, jnp.float32),
        "w3": pad2(w3, h2_p, d_out_p, compute_dtype),
        "b3": pad2(b3, 1, d_out_p, jnp.float32),
        "dims": (d_in, h1, h2, d_out),
    }


# ---------------------------------------------------------------------------
# Pallas-call wrapper.
# ---------------------------------------------------------------------------
def mlp_pallas(x_flat, prepared, *, force_tiled=False):
    B, D_in = x_flat.shape
    d_in0, H1, H2, D_out = prepared["dims"]
    assert D_in == d_in0, "input feature size mismatch"

    w1p, b1p = prepared["w1"], prepared["b1"]
    w2p, b2p = prepared["w2"], prepared["b2"]
    w3p, b3p = prepared["w3"], prepared["b3"]

    D_in_p, H1_p = w1p.shape
    H2_p = w2p.shape[1]
    D_out_p = w3p.shape[1]
    cdt = w1p.dtype
    itemsize = jnp.dtype(cdt).itemsize
    out_dtype = x_flat.dtype
    out_isz = jnp.dtype(out_dtype).itemsize

    vmem_cap = _vmem_capacity_bytes()
    small_vmem = vmem_cap <= (64 << 20)          # v7x-class (64 MiB, 2 TCs)
    single_buf = _single_buffered_weights_supported()
    wbuf = 1 if single_buf else 2

    max_tm = 256 if small_vmem else 512
    TM, B_p = _pick_tm(B, max_tm=max_tm, prefer_two_steps=small_vmem)

    # --- VMEM budget for the all-resident path -----------------------------
    weight_bytes = wbuf * (D_in_p * H1_p + H1_p * H2_p + H2_p * D_out_p) * itemsize
    bias_bytes = wbuf * (H1_p + H2_p + D_out_p) * 4
    act_bytes = 2 * TM * (D_in_p * itemsize + D_out_p * out_isz)
    tmp_bytes = TM * (H1_p + H2_p) * 4 + TM * max(H1_p, H2_p) * itemsize
    resident_total = weight_bytes + bias_bytes + act_bytes + tmp_bytes
    use_resident = (not force_tiled) and resident_total <= int(0.75 * vmem_cap)

    # --- activation padding (skipped when already aligned) -----------------
    xp = x_flat.astype(cdt)
    if (B_p, D_in_p) != (B, D_in):
        xp = jnp.pad(xp, ((0, B_p - B), (0, D_in_p - D_in)))

    flops = 2 * B * (D_in * H1 + H1 * H2 + H2 * D_out)
    weight_hbm = (D_in * H1 + H1 * H2 + H2 * D_out) * itemsize + (H1 + H2 + D_out) * 4
    act_hbm = B * D_in * itemsize + B * D_out * out_isz

    def resident_spec(shape):
        if single_buf:
            return pl.BlockSpec(shape, lambda *_: (0, 0),
                                pipeline_mode=pl.Buffered(1))
        return pl.BlockSpec(shape, lambda *_: (0, 0))

    def clamp_limit(estimate):
        limit = max(int(estimate * 1.25) + (4 << 20), 16 << 20)
        return min(limit, int(0.9 * vmem_cap))

    if use_resident:
        grid = (B_p // TM,)
        out_p = pl.pallas_call(
            _mlp_kernel_resident,
            out_shape=jax.ShapeDtypeStruct((B_p, D_out_p), out_dtype),
            grid_spec=pltpu.PrefetchScalarGridSpec(
                num_scalar_prefetch=0,
                grid=grid,
                in_specs=[
                    pl.BlockSpec((TM, D_in_p), lambda i: (i, 0)),   # pipelined
                    resident_spec(w1p.shape), resident_spec(b1p.shape),
                    resident_spec(w2p.shape), resident_spec(b2p.shape),
                    resident_spec(w3p.shape), resident_spec(b3p.shape),
                ],
                out_specs=pl.BlockSpec((TM, D_out_p), lambda i: (i, 0)),
            ),
            compiler_params=pltpu.CompilerParams(
                dimension_semantics=("parallel",),
                vmem_limit_bytes=clamp_limit(resident_total),
            ),
            cost_estimate=pl.CostEstimate(
                flops=flops, transcendentals=0,
                bytes_accessed=int(weight_hbm + act_hbm)),
        )(xp, w1p, b1p, w2p, b2p, w3p, b3p)
    else:
        # K/N-tiled fallback: stream w2 columns / w3 rows along last grid axis.
        TN = 128
        for cand in (512, 256, 128):
            if H2_p % cand == 0:
                TN = cand
                break
        nB = B_p // TM
        nJ = H2_p // TN

        tiled_total = (
            wbuf * (D_in_p * H1_p * itemsize + (H1_p + D_out_p) * 4)    # w1,b1,b3
            + 2 * (H1_p * TN + TN * D_out_p) * itemsize + 2 * TN * 4    # w2,w3,b2
            + 2 * TM * (D_in_p * itemsize + D_out_p * out_isz)          # x, out
            + TM * (H1_p + D_out_p) * 4                                 # scratch
            + TM * TN * 4 + TM * max(TN, H1_p) * itemsize               # temporaries
        )

        out_p = pl.pallas_call(
            _mlp_kernel_tiled,
            out_shape=jax.ShapeDtypeStruct((B_p, D_out_p), out_dtype),
            grid_spec=pltpu.PrefetchScalarGridSpec(
                num_scalar_prefetch=0,
                grid=(nB, nJ),
                in_specs=[
                    pl.BlockSpec((TM, D_in_p), lambda i, j: (i, 0)),
                    resident_spec(w1p.shape), resident_spec(b1p.shape),
                    pl.BlockSpec((H1_p, TN), lambda i, j: (0, j)),
                    pl.BlockSpec((1, TN), lambda i, j: (0, j)),
                    pl.BlockSpec((TN, D_out_p), lambda i, j: (j, 0)),
                    resident_spec(b3p.shape),
                ],
                out_specs=pl.BlockSpec((TM, D_out_p), lambda i, j: (i, 0)),
                scratch_shapes=[
                    pltpu.VMEM((TM, H1_p), jnp.float32),      # h1 (kept across j)
                    pltpu.VMEM((TM, D_out_p), jnp.float32),   # output accumulator
                ],
            ),
            compiler_params=pltpu.CompilerParams(
                dimension_semantics=("parallel", "arbitrary"),
                vmem_limit_bytes=clamp_limit(tiled_total),
            ),
            cost_estimate=pl.CostEstimate(
                flops=flops, transcendentals=0,
                bytes_accessed=int(act_hbm + D_in * H1 * itemsize
                                   + (H1 * H2 + H2 * D_out) * itemsize * nB
                                   + (H1 + H2 + D_out) * 4)),
        )(xp, w1p, b1p, w2p, b2p, w3p, b3p)

    if (B_p, D_out_p) != (B, D_out):
        out_p = out_p[:B, :D_out]
    return out_p


def mlp_forward(x, prepared, *, force_tiled=False):
    """x: (B, C, H, W) NCHW. Returns (B, C, H, H) like the PyTorch module."""
    B, C, H, W = x.shape
    D_in, _, _, D_out = prepared["dims"]
    assert D_in == C * H * W, "input_size must equal C*H*W"
    assert D_out == C * H * H, "output_size must equal C*H*H"
    x_flat = x.reshape(B, C * H * W)          # row-major flatten == nn.Flatten
    out = mlp_pallas(x_flat, prepared, force_tiled=force_tiled)
    return out.reshape(B, C, H, H)


# ---------------------------------------------------------------------------
# Init + reference + test.
# ---------------------------------------------------------------------------
def init_params(key, input_size, hidden_size, output_size, dtype=jnp.float32):
    """PyTorch-style (uniform +/- 1/sqrt(fan_in)) Linear init; 1-D biases."""
    ks = jax.random.split(key, 6)

    def linear(kw, kb, fan_in, fan_out):
        bound = 1.0 / (fan_in ** 0.5)
        w = jax.random.uniform(kw, (fan_in, fan_out), dtype, -bound, bound)
        b = jax.random.uniform(kb, (fan_out,), dtype, -bound, bound)
        return w, b

    w1, b1 = linear(ks[0], ks[1], input_size, hidden_size)
    w2, b2 = linear(ks[2], ks[3], hidden_size, hidden_size)
    w3, b3 = linear(ks[4], ks[5], hidden_size, output_size)
    return (w1, b1, w2, b2, w3, b3)


def mlp_reference(x, params):
    w1, b1, w2, b2, w3, b3 = params
    B, C, H, _ = x.shape
    hp = jax.lax.Precision.HIGHEST
    xf = x.reshape(B, -1)
    h = jnp.maximum(jnp.dot(xf, w1, precision=hp) + b1.reshape(1, -1), 0.0)
    h = jnp.maximum(jnp.dot(h, w2, precision=hp) + b2.reshape(1, -1), 0.0)
    out = jnp.dot(h, w3, precision=hp) + b3.reshape(1, -1)
    return out.reshape(B, C, H, H)


if __name__ == "__main__":
    key = jax.random.PRNGKey(0)
    k_x, k_p = jax.random.split(key)

    # Shapes consistent with the module's forward: output reshapes to
    # (B, C, H, H), so input_size = C*H*W and output_size = C*H*H (W == H).
    B, C, H, W = 2, 4, 16, 16
    input_size = C * H * W        # 1024
    hidden_size = 32
    output_size = C * H * H       # 1024

    x = jax.random.normal(k_x, (B, C, H, W), dtype=jnp.float32)
    params = init_params(k_p, input_size, hidden_size, output_size)
    ref = mlp_reference(x, params)

    # f32 path (tight correctness check).
    prep_f32 = prepare_mlp_params(*params, compute_dtype=jnp.float32)
    out_f32 = jax.block_until_ready(mlp_forward(x, prep_f32))
    assert out_f32.shape == (B, C, H, H)
    assert jnp.allclose(out_f32, ref, atol=2e-5, rtol=2e-5)

    # Default bf16 MXU-input path (f32 accumulation keeps it close to f32).
    prep_bf16 = prepare_mlp_params(*params)           # compute_dtype=bfloat16
    out_bf16 = jax.block_until_ready(mlp_forward(x, prep_bf16))
    assert out_bf16.shape == (B, C, H, H)
    assert bool(jnp.all(jnp.isfinite(out_bf16)))
    assert float(jnp.max(jnp.abs(out_bf16 - ref))) < 5e-2

    # Exercise the K/N-tiled fallback (weights-too-large-for-VMEM path) at
    # small shapes by forcing it, with a hidden size giving >1 reduction step.
    hidden2 = 384
    params2 = init_params(jax.random.PRNGKey(1), input_size, hidden2, output_size)
    prep2 = prepare_mlp_params(*params2, compute_dtype=jnp.float32)
    out_tiled = jax.block_until_ready(mlp_forward(x, prep2, force_tiled=True))
    ref2 = mlp_reference(x, params2)
    assert out_tiled.shape == (B, C, H, H)
    assert jnp.allclose(out_tiled, ref2, atol=2e-5, rtol=2e-5)

    print("KERNEL_OK")
</pallas_src>

<mosaic_0001>
module attributes {stable_mosaic.version = 11 : i64} {
  func.func @_probe_copy_kernel(%arg0: i32, %arg1: memref<8x128xf32, #tpu.memory_space<vmem>>, %arg2: memref<8x128xf32, #tpu.memory_space<vmem>>) attributes {dimension_semantics = [#tpu.dimension_semantics<arbitrary>], iteration_bounds = array<i64: 2>, scalar_prefetch = 0 : i64, scratch_operands = 0 : i64, tpu.core_type = #tpu.core_type<tc>, window_params = [{pipeline_mode = #tpu.pipeline_mode<synchronous>, transform_indices = @transform_0, window_bounds = array<i64: 8, 128>}, {pipeline_mode = #tpu.pipeline_mode<synchronous>, transform_indices = @transform_1, window_bounds = array<i64: 8, 128>}]} {
    %c0 = arith.constant 0 : index
    %c0_0 = arith.constant 0 : index
    %0 = vector.load %arg1[%c0, %c0_0] : memref<8x128xf32, #tpu.memory_space<vmem>>, vector<8x128xf32>
    %c0_1 = arith.constant 0 : index
    %c0_2 = arith.constant 0 : index
    %1 = vector.load %arg2[%c0_1, %c0_2] : memref<8x128xf32, #tpu.memory_space<vmem>>, vector<8x128xf32>
    tpu.vector_store %arg2[%c0_1, %c0_2], %0 {strides = array<i32>} : memref<8x128xf32, #tpu.memory_space<vmem>>, vector<8x128xf32>,
    return
  }
  func.func @transform_0(%arg0: i32) -> (i32, i32) {
    %c0_i32 = arith.constant 0 : i32
    %c0_i32_0 = arith.constant 0 : i32
    %c0_i32_1 = arith.constant 0 : i32
    return %c0_i32, %c0_i32_0 : i32, i32
  }
  func.func @transform_1(%arg0: i32) -> (i32, i32) {
    %c0_i32 = arith.constant 0 : i32
    %c0_i32_0 = arith.constant 0 : i32
    %c0_i32_1 = arith.constant 0 : i32
    return %c0_i32, %c0_i32_0 : i32, i32
  }
}

module attributes {stable_mosaic.version = 11 : i64} {
  func.func @_mlp_kernel_resident(%arg0: i32, %arg1: memref<8x1024xf32, #tpu.memory_space<vmem>>, %arg2: memref<1024x128xf32, #tpu.memory_space<vmem>>, %arg3: memref<1x128xf32, #tpu.memory_space<vmem>>, %arg4: memref<128x128xf32, #tpu.memory_space<vmem>>, %arg5: memref<1x128xf32, #tpu.memory_space<vmem>>, %arg6: memref<128x1024xf32, #tpu.memory_space<vmem>>, %arg7: memref<1x1024xf32, #tpu.memory_space<vmem>>, %arg8: memref<8x1024xf32, #tpu.memory_space<vmem>>) attributes {dimension_semantics = [#tpu.dimension_semantics<parallel>], iteration_bounds = array<i64: 1>, scalar_prefetch = 0 : i64, scratch_operands = 0 : i64, tpu.core_type = #tpu.core_type<tc>, window_params = [{transform_indices = @transform_0, window_bounds = array<i64: 8, 1024>}, {pipeline_mode = #tpu.pipeline_mode<synchronous>, transform_indices = @transform_1, window_bounds = array<i64: 1024, 128>}, {pipeline_mode = #tpu.pipeline_mode<synchronous>, transform_indices = @transform_2, window_bounds = array<i64: 1, 128>}, {pipeline_mode = #tpu.pipeline_mode<synchronous>, transform_indices = @transform_3, window_bounds = array<i64: 128, 128>}, {pipeline_mode = #tpu.pipeline_mode<synchronous>, transform_indices = @transform_4, window_bounds = array<i64: 1, 128>}, {pipeline_mode = #tpu.pipeline_mode<synchronous>, transform_indices = @transform_5, window_bounds = array<i64: 128, 1024>}, {pipeline_mode = #tpu.pipeline_mode<synchronous>, transform_indices = @transform_6, window_bounds = array<i64: 1, 1024>}, {transform_indices = @transform_7, window_bounds = array<i64: 8, 1024>}]} {
    %c0 = arith.constant 0 : index
    %c0_0 = arith.constant 0 : index
    %0 = vector.load %arg1[%c0, %c0_0] : memref<8x1024xf32, #tpu.memory_space<vmem>>, vector<8x1024xf32>
    %c0_1 = arith.constant 0 : index
    %c0_2 = arith.constant 0 : index
    %1 = vector.load %arg2[%c0_1, %c0_2] : memref<1024x128xf32, #tpu.memory_space<vmem>>, vector<1024x128xf32>
    %cst = arith.constant dense<0.000000e+00> : vector<8x128xf32>
    %2 = tpu.matmul %0, %1, %cst {dimension_numbers = #tpu.dot_dimension_numbers<[1], [0], [0], [1], [0, 0, 1, 1], [], []>} : vector<8x1024xf32>, vector<1024x128xf32>, vector<8x128xf32> -> vector<8x128xf32>
    %c0_3 = arith.constant 0 : index
    %c0_4 = arith.constant 0 : index
    %3 = vector.load %arg3[%c0_3, %c0_4] : memref<1x128xf32, #tpu.memory_space<vmem>>, vector<1x128xf32>
    %4 = vector.broadcast %3 : vector<1x128xf32> to vector<8x128xf32>
    %5 = arith.addf %2, %4 : vector<8x128xf32>
    %cst_5 = arith.constant 0.000000e+00 : f32
    %6 = vector.broadcast %cst_5 : f32 to vector<8x128xf32>
    %7 = arith.maximumf %5, %6 : vector<8x128xf32>
    %c0_6 = arith.constant 0 : index
    %c0_7 = arith.constant 0 : index
    %8 = vector.load %arg4[%c0_6, %c0_7] : memref<128x128xf32, #tpu.memory_space<vmem>>, vector<128x128xf32>
    %cst_8 = arith.constant dense<0.000000e+00> : vector<8x128xf32>
    %9 = tpu.matmul %7, %8, %cst_8 {dimension_numbers = #tpu.dot_dimension_numbers<[1], [0], [0], [1], [0, 0, 1, 1], [], []>} : vector<8x128xf32>, vector<128x128xf32>, vector<8x128xf32> -> vector<8x128xf32>
    %c0_9 = arith.constant 0 : index
    %c0_10 = arith.constant 0 : index
    %10 = vector.load %arg5[%c0_9, %c0_10] : memref<1x128xf32, #tpu.memory_space<vmem>>, vector<1x128xf32>
    %11 = vector.broadcast %10 : vector<1x128xf32> to vector<8x128xf32>
    %12 = arith.addf %9, %11 : vector<8x128xf32>
    %cst_11 = arith.constant 0.000000e+00 : f32
    %13 = vector.broadcast %cst_11 : f32 to vector<8x128xf32>
    %14 = arith.maximumf %12, %13 : vector<8x128xf32>
    %c0_12 = arith.constant 0 : index
    %c0_13 = arith.constant 0 : index
    %15 = vector.load %arg6[%c0_12, %c0_13] : memref<128x1024xf32, #tpu.memory_space<vmem>>, vector<128x1024xf32>
    %cst_14 = arith.constant dense<0.000000e+00> : vector<8x1024xf32>
    %16 = tpu.matmul %14, %15, %cst_14 {dimension_numbers = #tpu.dot_dimension_numbers<[1], [0], [0], [1], [0, 0, 1, 1], [], []>} : vector<8x128xf32>, vector<128x1024xf32>, vector<8x1024xf32> -> vector<8x1024xf32>
    %c0_15 = arith.constant 0 : index
    %c0_16 = arith.constant 0 : index
    %17 = vector.load %arg7[%c0_15, %c0_16] : memref<1x1024xf32, #tpu.memory_space<vmem>>, vector<1x1024xf32>
    %18 = vector.broadcast %17 : vector<1x1024xf32> to vector<8x1024xf32>
    %19 = arith.addf %16, %18 : vector<8x1024xf32>
    %c0_17 = arith.constant 0 : index
    %c0_18 = arith.constant 0 : index
    %20 = vector.load %arg8[%c0_17, %c0_18] : memref<8x1024xf32, #tpu.memory_space<vmem>>, vector<8x1024xf32>
    tpu.vector_store %arg8[%c0_17, %c0_18], %19 {strides = array<i32>} : memref<8x1024xf32, #tpu.memory_space<vmem>>, vector<8x1024xf32>,
    return
  }
  func.func @transform_0(%arg0: i32) -> (i32, i32) {
    %c0_i32 = arith.constant 0 : i32
    %c0_i32_0 = arith.constant 0 : i32
    return %arg0, %c0_i32 : i32, i32
  }
  func.func @transform_1(%arg0: i32) -> (i32, i32) {
    %c0_i32 = arith.constant 0 : i32
    %c0_i32_0 = arith.constant 0 : i32
    %c0_i32_1 = arith.constant 0 : i32
    return %c0_i32, %c0_i32_0 : i32, i32
  }
  func.func @transform_2(%arg0: i32) -> (i32, i32) {
    %c0_i32 = arith.constant 0 : i32
    %c0_i32_0 = arith.constant 0 : i32
    %c0_i32_1 = arith.constant 0 : i32
    return %c0_i32, %c0_i32_0 : i32, i32
  }
  func.func @transform_3(%arg0: i32) -> (i32, i32) {
    %c0_i32 = arith.constant 0 : i32
    %c0_i32_0 = arith.constant 0 : i32
    %c0_i32_1 = arith.constant 0 : i32
    return %c0_i32, %c0_i32_0 : i32, i32
  }
  func.func @transform_4(%arg0: i32) -> (i32, i32) {
    %c0_i32 = arith.constant 0 : i32
    %c0_i32_0 = arith.constant 0 : i32
    %c0_i32_1 = arith.constant 0 : i32
    return %c0_i32, %c0_i32_0 : i32, i32
  }
  func.func @transform_5(%arg0: i32) -> (i32, i32) {
    %c0_i32 = arith.constant 0 : i32
    %c0_i32_0 = arith.constant 0 : i32
    %c0_i32_1 = arith.constant 0 : i32
    return %c0_i32, %c0_i32_0 : i32, i32
  }
  func.func @transform_6(%arg0: i32) -> (i32, i32) {
    %c0_i32 = arith.constant 0 : i32
    %c0_i32_0 = arith.constant 0 : i32
    %c0_i32_1 = arith.constant 0 : i32
    return %c0_i32, %c0_i32_0 : i32, i32
  }
  func.func @transform_7(%arg0: i32) -> (i32, i32) {
    %c0_i32 = arith.constant 0 : i32
    %c0_i32_0 = arith.constant 0 : i32
    return %arg0, %c0_i32 : i32, i32
  }
}

</mosaic_0001>

<bundles_post_ra>
// kernel: tpu_custom_call.1
= control target key start
LH: loop header
LB: loop body
LE: loop exit
PB: predicated region body
PF: predicated region fallthrough
CT: control target
= control target key end

     0   :  { %6 = vsyncpa [#allocation3], 0  ;;  %s286_s0 = inlined_call_operand.hbm [shape: f32[8,128], index: 0, kind: input, shape index: {}]   ;;  %s287_s1 = inlined_call_operand.hbm [shape: f32[8,128], index: 1, kind: output, shape index: {}]  }
   0x1   :  { %7 = vsyncpa [#allocation4], 0  ;;  %s269_s6 = smov 0  }
   0x2 LB: > { %s148_s7 = sadd.s32 4294967295, %s255_s6   ;;  %p149_p0 = scmp.ge.s32.totalorder %s255_s6, 1  ;;  %s255_s6 = sphi %s269_s6, %s13_s6  }
   0x3   : > { %p60_p1 = scmp.lt.s32.totalorder %s255_s6, 3  ;;  %s72_s10 = sshll.u32 %s286_s0, 4  ;;  %s73_s10 = int_to_ptr.hbm [resolvable:$true] %s72_s10 }
   0x4   : > { %p169_p3 = scmp.eq.s32.totalorder %s148_s7, 0  ;;  %s257_s11 = smov [#allocation2]  }
   0x5   : > { %p61_p2 = pnand %p149_p0, %p60_p1  ;;  %s74_s12 = sshll.u32 %s257_s11, 4  ;;  %s75_s12 = int_to_ptr.vmem [resolvable:$true] %s74_s12 }
   0x7   : > { %p165_p4 = pneg %p61_p2  ;;  %87 = sbr.rel (%p61_p2) target bundleno = 19 (0x13), region = 24 }
   0x9   : > { %p166_p5 = pnand %p169_p3, %p165_p4 }
   0xb   : > { %168 = dma.hbm_to_vmem [thread:$0]  (!%p166_p5), %s73_s10, 128, %s75_s12, [#allocation3]  }
   0xc   : > { %246 = dma.done.wait (%p169_p3), [#allocation3], 128  }
   0xd   : > { %248 = vsyncadd (%p169_p3), [#allocation3], 4294967168  ;;  %s258_s13 = smov [#allocation5]   ;;  %s108_s17 = sshll.u32 %s287_s1, 4  ;;  %v98_v0 = vld [vmem:[#allocation2] sm:$0xff]  ;;  %s109_s17 = int_to_ptr.hbm [resolvable:$true] %s108_s17 }
   0xe   : > { %s106_s14 = sshll.u32 %s258_s13, 4  ;;  %p171_p6 = scmp.eq.s32.totalorder %s148_s7, 1  ;;  %99 = vst [vmem:[#allocation5] sm:$0xff] %v98_v0  ;;  %s107_s14 = int_to_ptr.vmem [resolvable:$true] %s106_s14 }
  0x10   : > { %162 = dma.vmem_to_hbm [thread:$0]  (%p171_p6), %s107_s14, 128, %s109_s17, [#allocation4]  }
  0x11   : > { %250 = dma.done.wait (%p171_p6), [#allocation4], 128  }
  0x12   : > { %252 = vsyncadd (%p171_p6), [#allocation4], 4294967168 }
  0x13 PF: > { %s13_s6 = sadd.s32 1, %s255_s6  }
  0x14   : > { %p10_p7 = scmp.ge.s32.totalorder %s13_s6, 4  }
  0x16   :  { %12 = sbr.rel (!%p10_p7) target bundleno = 2 (0x2), region = 53 }
  0x1b   :  { %122 = vsyncpa [#allocation3], 1 }
  0x1c   :  { %124 = vsyncpa [#allocation3 + $0x1], 1 }
  0x1d   :  { %125 = vsyncpa [#allocation4], 1 }
  0x1e   :  { %127 = vsyncpa [#allocation4 + $0x1], 1 }

// kernel: tpu_custom_call.1
= control target key start
LH: loop header
LB: loop body
LE: loop exit
PB: predicated region body
PF: predicated region fallthrough
CT: control target
= control target key end

     0   :  { %12 = vsyncpa [#allocation3], 0  ;;  %s1014_s0 = inlined_call_operand.hbm [shape: f32[8,1024], index: 0, kind: input, shape index: {}]   ;;  %s1015_s1 = inlined_call_operand.hbm [shape: f32[1024,128], index: 1, kind: input, shape index: {}]   ;;  %s1016_s2 = inlined_call_operand.vmem [shape: f32[1,128], index: 2, kind: input, shape index: {}]   ;;  %s1017_s3 = inlined_call_operand.hbm [shape: f32[128,128], index: 3, kind: input, shape index: {}]   ;;  %s1018_s4 = inlined_call_operand.vmem [shape: f32[1,128], index: 4, kind: input, shape index: {}]   ;;  %s1019_s5 = inlined_call_operand.hbm [shape: f32[128,1024], index: 5, kind: input, shape index: {}]   ;;  %s1020_s6 = inlined_call_operand.hbm [shape: f32[1,1024], index: 6, kind: input, shape index: {}]   ;;  %s1021_s7 = inlined_call_operand.hbm [shape: f32[8,1024], index: 7, kind: output, shape index: {}]  }
   0x1   :  { %13 = vsyncpa [#allocation6], 0 }
   0x2   :  { %14 = vsyncpa [#allocation9], 0  ;;  %s31_s26 = sshll.u32 %s1015_s1, 4  ;;  %s32_s26 = int_to_ptr.hbm [resolvable:$true] %s31_s26 }
   0x3   :  { %15 = vsyncpa [#allocation4], 0  ;;  %s940_s27 = smov [#allocation5]   ;;  %s61_s8 = sshll.u32 %s1019_s5, 4  ;;  %s62_s8 = int_to_ptr.hbm [resolvable:$true] %s61_s8 }
   0x4   :  { %s33_s28 = sshll.u32 %s940_s27, 4  ;;  %s941_s9 = smov 128   ;;  %s34_s28 = int_to_ptr.vmem [resolvable:$true] %s33_s28 }
   0x5   :  { %s942_s10 = smov 8   ;;  %s943_s11 = smov [#allocation8]  }
   0x6   :  { %39 = dma.hbm_to_vmem [thread:$0]  %s32_s26, 16384, %s34_s28, [#allocation6], %s941_s9, %s941_s9, %s942_s10  }
   0x7   :  { %s63_s12 = sshll.u32 %s943_s11, 4  ;;  %s944_s13 = smov 1024   ;;  %s64_s12 = int_to_ptr.vmem [resolvable:$true] %s63_s12 }
   0x8   :  { %s945_s14 = smov 64   ;;  %s21_s16 = sshll.u32 %s1014_s0, 4  ;;  %s22_s16 = int_to_ptr.hbm [resolvable:$true] %s21_s16 }
   0x9   :  { %69 = dma.hbm_to_vmem [thread:$0]  %s62_s8, 16384, %s64_s12, [#allocation9], %s944_s13, %s944_s13, %s945_s14  }
   0xa   :  { %s946_s17 = smov [#allocation2]   ;;  %s46_s20 = sshll.u32 %s1017_s3, 4  ;;  %s47_s20 = int_to_ptr.hbm [resolvable:$true] %s46_s20 }
   0xb   :  { %s23_s18 = sshll.u32 %s946_s17, 4  ;;  %s947_s21 = smov [#allocation7]   ;;  %s24_s18 = int_to_ptr.vmem [resolvable:$true] %s23_s18 }
   0xc   :  { %26 = dma.hbm_to_vmem [thread:$0]  %s22_s16, 1024, %s24_s18, [#allocation3]  }
   0xd   :  { %s48_s22 = sshll.u32 %s947_s21, 4  ;;  %s75_s25 = sshll.u32 %s1020_s6, 4  ;;  %s49_s22 = int_to_ptr.vmem [resolvable:$true] %s48_s22  ;;  %s76_s25 = int_to_ptr.hbm [resolvable:$true] %s75_s25 }
   0xe   :  { %54 = dma.hbm_to_vmem [thread:$0]  %s47_s20, 2048, %s49_s22, [#allocation6], %s941_s9, %s941_s9, %s942_s10  }
   0xf   :  { %s948_s0 = smov [#allocation10]  }
  0x10   :  { %s77_s26 = sshll.u32 %s948_s0, 4  ;;  %s78_s26 = int_to_ptr.vmem [resolvable:$true] %s77_s26 }
  0x11   :  { %80 = dma.hbm_to_vmem [thread:$0]  %s76_s25, 128, %s78_s26, [#allocation9]  }
  0x12   :  { %932 = dma.done.wait [#allocation3], 1024  }
  0x13   :  { %933 = vsyncadd [#allocation3], 4294966272 }
  0x14   :  { %934 = dma.done.wait [#allocation6], 18432  }
  0x15   :  { %935 = vsyncadd [#allocation6], 4294948864 }
  0x16   :  { %936 = dma.done.wait [#allocation9], 16512  }
  0x17   :  { %937 = vsyncadd [#allocation9], 4294950784  ;;  %v156_v0 = vld [vmem:[#allocation5 + $0x178] sm:$0xff]  ;;  %v155_v2 = vld [vmem:[#allocation5 + $0x170] sm:$0xff]  ;;  %s764_s8 = sshll.u32 %s1021_s7, 4  ;;  %s765_s8 = int_to_ptr.hbm [resolvable:$true] %s764_s8 }
  0x18   :  { %v124_v1 = vld [vmem:[#allocation5 + $0x78] sm:$0xff]  ;;  %281 = vmatpush.msra.mxu2 %v156_v0  ;;  %v123_v4 = vld [vmem:[#allocation5 + $0x70] sm:$0xff]  ;;  %v154_v6 = vld [vmem:[#allocation5 + $0x168] sm:$0xff] }
  0x19   :  { %241 = vmatpush.msra.mxu0 %v124_v1  ;;  %v172_v3 = vld [vmem:[#allocation5 + $0x1f8] sm:$0xff]  ;;  %v171_v7 = vld [vmem:[#allocation5 + $0x1f0] sm:$0xff]  ;;  %v122_v8 = vld [vmem:[#allocation5 + $0x68] sm:$0xff] }
  0x1a   :  { %v140_v5 = vld [vmem:[#allocation5 + $0xf8] sm:$0xff]  ;;  %301 = vmatpush.msra.mxu3 %v172_v3  ;;  %282 = vmatpush.msra.mxu2 %v155_v2  ;;  %v139_v9 = vld [vmem:[#allocation5 + $0xf0] sm:$0xff]  ;;  %v170_v10 = vld [vmem:[#allocation5 + $0x1e8] sm:$0xff] }
  0x1b   :  { %261 = vmatpush.msra.mxu1 %v140_v5  ;;  %242 = vmatpush.msra.mxu0 %v123_v4  ;;  %v153_v11 = vld [vmem:[#allocation5 + $0x160] sm:$0xff]  ;;  %v138_v13 = vld [vmem:[#allocation5 + $0xe8] sm:$0xff]  ;;  %v152_v16 = vld [vmem:[#allocation5 + $0x158] sm:$0xff] }
  0x1c   :  { %302 = vmatpush.msra.mxu3 %v171_v7  ;;  %v121_v12 = vld [vmem:[#allocation5 + $0x60] sm:$0xff]  ;;  %283 = vmatpush.msra.mxu2 %v154_v6  ;;  %v120_v17 = vld [vmem:[#allocation5 + $0x58] sm:$0xff]  ;;  %v151_v20 = vld [vmem:[#allocation5 + $0x150] sm:$0xff] }
  0x1d   :  { %262 = vmatpush.msra.mxu1 %v139_v9  ;;  %243 = vmatpush.msra.mxu0 %v122_v8  ;;  %v169_v14 = vld [vmem:[#allocation5 + $0x1e0] sm:$0xff]  ;;  %v168_v18 = vld [vmem:[#allocation5 + $0x1d8] sm:$0xff]  ;;  %v119_v21 = vld [vmem:[#allocation5 + $0x50] sm:$0xff] }
  0x1e   :  { %v137_v15 = vld [vmem:[#allocation5 + $0xe0] sm:$0xff]  ;;  %303 = vmatpush.msra.mxu3 %v170_v10  ;;  %284 = vmatpush.msra.mxu2 %v153_v11  ;;  %v136_v19 = vld [vmem:[#allocation5 + $0xd8] sm:$0xff]  ;;  %v167_v22 = vld [vmem:[#allocation5 + $0x1d0] sm:$0xff] }
  0x1f   :  { %263 = vmatpush.msra.mxu1 %v138_v13  ;;  %244 = vmatpush.msra.mxu0 %v121_v12  ;;  %v135_v23 = vld [vmem:[#allocation5 + $0xd0] sm:$0xff]  ;;  %v150_v24 = vld [vmem:[#allocation5 + $0x148] sm:$0xff]  ;;  %v149_v28 = vld [vmem:[#allocation5 + $0x140] sm:$0xff] }
  0x20   :  { %304 = vmatpush.msra.mxu3 %v169_v14  ;;  %285 = vmatpush.msra.mxu2 %v152_v16  ;;  %v118_v25 = vld [vmem:[#allocation5 + $0x48] sm:$0xff]  ;;  %v117_v29 = vld [vmem:[#allocation5 + $0x40] sm:$0xff]  ;;  %v148_v32 = vld [vmem:[#allocation5 + $0x138] sm:$0xff] }
  0x21   :  { %264 = vmatpush.msra.mxu1 %v137_v15  ;;  %245 = vmatpush.msra.mxu0 %v120_v17  ;;  %v166_v26 = vld [vmem:[#allocation5 + $0x1c8] sm:$0xff]  ;;  %v165_v30 = vld [vmem:[#allocation5 + $0x1c0] sm:$0xff]  ;;  %v116_v33 = vld [vmem:[#allocation5 + $0x38] sm:$0xff] }
  0x22   :  { %305 = vmatpush.msra.mxu3 %v168_v18  ;;  %286 = vmatpush.msra.mxu2 %v151_v20  ;;  %v134_v27 = vld [vmem:[#allocation5 + $0xc8] sm:$0xff]  ;;  %v133_v31 = vld [vmem:[#allocation5 + $0xc0] sm:$0xff]  ;;  %v164_v34 = vld [vmem:[#allocation5 + $0x1b8] sm:$0xff] }
  0x23   :  { %265 = vmatpush.msra.mxu1 %v136_v19  ;;  %246 = vmatpush.msra.mxu0 %v119_v21  ;;  %v132_v35 = vld [vmem:[#allocation5 + $0xb8] sm:$0xff]  ;;  %v147_v36 = vld [vmem:[#allocation5 + $0x130] sm:$0xff]  ;;  %v146_v40 = vld [vmem:[#allocation5 + $0x128] sm:$0xff] }
  0x24   :  { %306 = vmatpush.msra.mxu3 %v167_v22  ;;  %287 = vmatpush.msra.mxu2 %v150_v24  ;;  %v115_v37 = vld [vmem:[#allocation5 + $0x30] sm:$0xff]  ;;  %v114_v41 = vld [vmem:[#allocation5 + $0x28] sm:$0xff]  ;;  %v145_v44 = vld [vmem:[#allocation5 + $0x120] sm:$0xff] }
  0x25   :  { %266 = vmatpush.msra.mxu1 %v135_v23  ;;  %247 = vmatpush.msra.mxu0 %v118_v25  ;;  %v163_v38 = vld [vmem:[#allocation5 + $0x1b0] sm:$0xff]  ;;  %v162_v42 = vld [vmem:[#allocation5 + $0x1a8] sm:$0xff]  ;;  %v113_v45 = vld [vmem:[#allocation5 + $0x20] sm:$0xff] }
  0x26   :  { %307 = vmatpush.msra.mxu3 %v166_v26  ;;  %288 = vmatpush.msra.mxu2 %v149_v28  ;;  %v131_v39 = vld [vmem:[#allocation5 + $0xb0] sm:$0xff]  ;;  %v130_v43 = vld [vmem:[#allocation5 + $0xa8] sm:$0xff]  ;;  %v161_v46 = vld [vmem:[#allocation5 + $0x1a0] sm:$0xff] }
  0x27   :  { %267 = vmatpush.msra.mxu1 %v134_v27  ;;  %248 = vmatpush.msra.mxu0 %v117_v29  ;;  %v129_v47 = vld [vmem:[#allocation5 + $0xa0] sm:$0xff]  ;;  %v144_v48 = vld [vmem:[#allocation5 + $0x118] sm:$0xff]  ;;  %v143_v52 = vld [vmem:[#allocation5 + $0x110] sm:$0xff] }
  0x28   :  { %308 = vmatpush.msra.mxu3 %v165_v30  ;;  %289 = vmatpush.msra.mxu2 %v148_v32  ;;  %v112_v49 = vld [vmem:[#allocation5 + $0x18] sm:$0xff]  ;;  %v111_v53 = vld [vmem:[#allocation5 + $0x10] sm:$0xff]  ;;  %v142_v56 = vld [vmem:[#allocation5 + $0x108] sm:$0xff] }
  0x29   :  { %268 = vmatpush.msra.mxu1 %v133_v31  ;;  %249 = vmatpush.msra.mxu0 %v116_v33  ;;  %v160_v50 = vld [vmem:[#allocation5 + $0x198] sm:$0xff]  ;;  %v159_v54 = vld [vmem:[#allocation5 + $0x190] sm:$0xff]  ;;  %v110_v57 = vld [vmem:[#allocation5 + $0x8] sm:$0xff] }
  0x2a   :  { %309 = vmatpush.msra.mxu3 %v164_v34  ;;  %290 = vmatpush.msra.mxu2 %v147_v36  ;;  %v128_v51 = vld [vmem:[#allocation5 + $0x98] sm:$0xff]  ;;  %v127_v55 = vld [vmem:[#allocation5 + $0x90] sm:$0xff]  ;;  %v158_v58 = vld [vmem:[#allocation5 + $0x188] sm:$0xff] }
  0x2b   :  { %269 = vmatpush.msra.mxu1 %v132_v35  ;;  %250 = vmatpush.msra.mxu0 %v115_v37  ;;  %v126_v59 = vld [vmem:[#allocation5 + $0x88] sm:$0xff]  ;;  %v141_v60 = vld [vmem:[#allocation5 + $0x100] sm:$0xff]  ;;  %v220_v62 = vld [vmem:[#allocation5 + $0x378] sm:$0xff] }
  0x2c   :  { %310 = vmatpush.msra.mxu3 %v163_v38  ;;  %291 = vmatpush.msra.mxu2 %v146_v40  ;;  %v109_v61 = vld [vmem:[#allocation5] sm:$0xff]  ;;  %v188_v0 = vld [vmem:[#allocation5 + $0x278] sm:$0xff]  ;;  %v219_v2 = vld [vmem:[#allocation5 + $0x370] sm:$0xff] }
  0x2d   :  { %270 = vmatpush.msra.mxu1 %v131_v39  ;;  %251 = vmatpush.msra.mxu0 %v114_v41  ;;  %v157_v63 = vld [vmem:[#allocation5 + $0x180] sm:$0xff]  ;;  %v236_v1 = vld [vmem:[#allocation5 + $0x3f8] sm:$0xff]  ;;  %v187_v4 = vld [vmem:[#allocation5 + $0x270] sm:$0xff] }
  0x2e   :  { %311 = vmatpush.msra.mxu3 %v162_v42  ;;  %292 = vmatpush.msra.mxu2 %v145_v44  ;;  %v125_v3 = vld [vmem:[#allocation5 + $0x80] sm:$0xff]  ;;  %v204_v5 = vld [vmem:[#allocation5 + $0x2f8] sm:$0xff]  ;;  %v218_v6 = vld [vmem:[#allocation5 + $0x368] sm:$0xff] }
  0x2f   :  { %271 = vmatpush.msra.mxu1 %v130_v43  ;;  %252 = vmatpush.msra.mxu0 %v113_v45  ;;  %v235_v7 = vld [vmem:[#allocation5 + $0x3f0] sm:$0xff]  ;;  %v186_v8 = vld [vmem:[#allocation5 + $0x268] sm:$0xff]  ;;  %v217_v10 = vld [vmem:[#allocation5 + $0x360] sm:$0xff] }
  0x30   :  { %312 = vmatpush.msra.mxu3 %v161_v46  ;;  %293 = vmatpush.msra.mxu2 %v144_v48  ;;  %v203_v9 = vld [vmem:[#allocation5 + $0x2f0] sm:$0xff]  ;;  %v234_v11 = vld [vmem:[#allocation5 + $0x3e8] sm:$0xff]  ;;  %v185_v12 = vld [vmem:[#allocation5 + $0x260] sm:$0xff] }
  0x31   :  { %272 = vmatpush.msra.mxu1 %v129_v47  ;;  %253 = vmatpush.msra.mxu0 %v112_v49  ;;  %v202_v13 = vld [vmem:[#allocation5 + $0x2e8] sm:$0xff]  ;;  %v216_v14 = vld [vmem:[#allocation5 + $0x358] sm:$0xff]  ;;  %v233_v15 = vld [vmem:[#allocation5 + $0x3e0] sm:$0xff] }
  0x32   :  { %313 = vmatpush.msra.mxu3 %v160_v50  ;;  %294 = vmatpush.msra.mxu2 %v143_v52  ;;  %v184_v16 = vld [vmem:[#allocation5 + $0x258] sm:$0xff]  ;;  %v201_v17 = vld [vmem:[#allocation5 + $0x2e0] sm:$0xff]  ;;  %v215_v18 = vld [vmem:[#allocation5 + $0x350] sm:$0xff] }
  0x33   :  { %273 = vmatpush.msra.mxu1 %v128_v51  ;;  %254 = vmatpush.msra.mxu0 %v111_v53  ;;  %v232_v19 = vld [vmem:[#allocation5 + $0x3d8] sm:$0xff]  ;;  %v183_v20 = vld [vmem:[#allocation5 + $0x250] sm:$0xff]  ;;  %v214_v22 = vld [vmem:[#allocation5 + $0x348] sm:$0xff] }
  0x34   :  { %314 = vmatpush.msra.mxu3 %v159_v54  ;;  %295 = vmatpush.msra.mxu2 %v142_v56  ;;  %v200_v21 = vld [vmem:[#allocation5 + $0x2d8] sm:$0xff]  ;;  %v231_v23 = vld [vmem:[#allocation5 + $0x3d0] sm:$0xff]  ;;  %v182_v24 = vld [vmem:[#allocation5 + $0x248] sm:$0xff] }
  0x35   :  { %274 = vmatpush.msra.mxu1 %v127_v55  ;;  %255 = vmatpush.msra.mxu0 %v110_v57  ;;  %v199_v25 = vld [vmem:[#allocation5 + $0x2d0] sm:$0xff]  ;;  %v213_v26 = vld [vmem:[#allocation5 + $0x340] sm:$0xff]  ;;  %v230_v27 = vld [vmem:[#allocation5 + $0x3c8] sm:$0xff] }
  0x36   :  { %315 = vmatpush.msra.mxu3 %v158_v58  ;;  %296 = vmatpush.msra.mxu2 %v141_v60  ;;  %v181_v28 = vld [vmem:[#allocation5 + $0x240] sm:$0xff]  ;;  %v198_v29 = vld [vmem:[#allocation5 + $0x2c8] sm:$0xff]  ;;  %v212_v30 = vld [vmem:[#allocation5 + $0x338] sm:$0xff] }
  0x37   :  { %275 = vmatpush.msra.mxu1 %v126_v59  ;;  %256 = vmatpush.msra.mxu0 %v109_v61  ;;  %v229_v31 = vld [vmem:[#allocation5 + $0x3c0] sm:$0xff]  ;;  %v180_v32 = vld [vmem:[#allocation5 + $0x238] sm:$0xff]  ;;  %v211_v34 = vld [vmem:[#allocation5 + $0x330] sm:$0xff] }
  0x38   :  { %361 = vmatpush.msrb.mxu2 %v220_v62  ;;  %316 = vmatpush.msra.mxu3 %v157_v63  ;;  %v197_v33 = vld [vmem:[#allocation5 + $0x2c0] sm:$0xff]  ;;  %v228_v35 = vld [vmem:[#allocation5 + $0x3b8] sm:$0xff]  ;;  %v179_v36 = vld [vmem:[#allocation5 + $0x230] sm:$0xff] }
  0x39   :  { %321 = vmatpush.msrb.mxu0 %v188_v0  ;;  %276 = vmatpush.msra.mxu1 %v125_v3  ;;  %v196_v37 = vld [vmem:[#allocation5 + $0x2b8] sm:$0xff]  ;;  %v210_v38 = vld [vmem:[#allocation5 + $0x328] sm:$0xff]  ;;  %v227_v39 = vld [vmem:[#allocation5 + $0x3b0] sm:$0xff] }
  0x3a   :  { %381 = vmatpush.msrb.mxu3 %v236_v1  ;;  %362 = vmatpush.msrb.mxu2 %v219_v2  ;;  %v178_v40 = vld [vmem:[#allocation5 + $0x228] sm:$0xff]  ;;  %v195_v41 = vld [vmem:[#allocation5 + $0x2b0] sm:$0xff]  ;;  %v209_v42 = vld [vmem:[#allocation5 + $0x320] sm:$0xff] }
  0x3b   :  { %322 = vmatpush.msrb.mxu0 %v187_v4  ;;  %341 = vmatpush.msrb.mxu1 %v204_v5  ;;  %v226_v43 = vld [vmem:[#allocation5 + $0x3a8] sm:$0xff]  ;;  %v103_v44 = vld [vmem:[#allocation2 + $0x10] sm:$0xff]  ;;  %v177_v45 = vld [vmem:[#allocation5 + $0x220] sm:$0xff] }
  0x3c   :  { %363 = vmatpush.msrb.mxu2 %v218_v6  ;;  %382 = vmatpush.msrb.mxu3 %v235_v7  ;;  %v194_v46 = vld [vmem:[#allocation5 + $0x2a8] sm:$0xff]  ;;  %v208_v47 = vld [vmem:[#allocation5 + $0x318] sm:$0xff]  ;;  %v225_v48 = vld [vmem:[#allocation5 + $0x3a0] sm:$0xff] }
  0x3d   :  { %323 = vmatpush.msrb.mxu0 %v186_v8  ;;  %342 = vmatpush.msrb.mxu1 %v203_v9  ;;  %v101_v49 = vld [vmem:[#allocation2] sm:$0xff]  ;;  %v104_v50 = vld [vmem:[#allocation2 + $0x18] sm:$0xff]  ;;  %v207_v53 = vld [vmem:[#allocation5 + $0x310] sm:$0xff] }
  0x3e   :  { %364 = vmatpush.msrb.mxu2 %v217_v10  ;;  %383 = vmatpush.msrb.mxu3 %v234_v11  ;;  %v176_v51 = vld [vmem:[#allocation5 + $0x218] sm:$0xff]  ;;  %v193_v52 = vld [vmem:[#allocation5 + $0x2a0] sm:$0xff]  ;;  %v102_v55 = vld [vmem:[#allocation2 + $0x8] sm:$0xff] }
  0x3f   :  { %324 = vmatpush.msrb.mxu0 %v185_v12  ;;  %343 = vmatpush.msrb.mxu1 %v202_v13  ;;  %v224_v54 = vld [vmem:[#allocation5 + $0x398] sm:$0xff]  ;;  %v175_v56 = vld [vmem:[#allocation5 + $0x210] sm:$0xff]  ;;  %v206_v58 = vld [vmem:[#allocation5 + $0x308] sm:$0xff] }
  0x40   :  { %365 = vmatpush.msrb.mxu2 %v216_v14  ;;  %384 = vmatpush.msrb.mxu3 %v233_v15  ;;  %v192_v57 = vld [vmem:[#allocation5 + $0x298] sm:$0xff]  ;;  %v223_v59 = vld [vmem:[#allocation5 + $0x390] sm:$0xff]  ;;  %v174_v60 = vld [vmem:[#allocation5 + $0x208] sm:$0xff] }
  0x41   :  { %325 = vmatpush.msrb.mxu0 %v184_v16  ;;  %344 = vmatpush.msrb.mxu1 %v201_v17  ;;  %v191_v61 = vld [vmem:[#allocation5 + $0x290] sm:$0xff]  ;;  %v205_v62 = vld [vmem:[#allocation5 + $0x300] sm:$0xff]  ;;  %v222_v63 = vld [vmem:[#allocation5 + $0x388] sm:$0xff] }
  0x42   :  { %366 = vmatpush.msrb.mxu2 %v215_v18  ;;  %385 = vmatpush.msrb.mxu3 %v232_v19  ;;  %v107_v0 = vld [vmem:[#allocation2 + $0x30] sm:$0xff]  ;;  %v173_v1 = vld [vmem:[#allocation5 + $0x200] sm:$0xff]  ;;  %v190_v2 = vld [vmem:[#allocation5 + $0x288] sm:$0xff] }
  0x43   :  { %326 = vmatpush.msrb.mxu0 %v183_v20  ;;  %345 = vmatpush.msrb.mxu1 %v200_v21  ;;  %v221_v3 = vld [vmem:[#allocation5 + $0x380] sm:$0xff]  ;;  %v108_v5 = vld [vmem:[#allocation2 + $0x38] sm:$0xff]  ;;  %v106_v8 = vld [vmem:[#allocation2 + $0x28] sm:$0xff] }
  0x44   :  { %367 = vmatpush.msrb.mxu2 %v214_v22  ;;  %386 = vmatpush.msrb.mxu3 %v231_v23  ;;  %v105_v4 = vld [vmem:[#allocation2 + $0x20] sm:$0xff]  ;;  %v417_v7 = vld [vmem:[#allocation7 + $0x78] sm:$0xff]  ;;  %v416_v9 = vld [vmem:[#allocation7 + $0x70] sm:$0xff] }
  0x45   :  { %327 = vmatpush.msrb.mxu0 %v182_v24  ;;  %346 = vmatpush.msrb.mxu1 %v199_v25  ;;  %v189_v6 = vld [vmem:[#allocation5 + $0x280] sm:$0xff]  ;;  %v415_v10 = vld [vmem:[#allocation7 + $0x68] sm:$0xff]  ;;  %v413_v12 = vld [vmem:[#allocation7 + $0x58] sm:$0xff] }
  0x46   :  { %368 = vmatpush.msrb.mxu2 %v213_v26  ;;  %387 = vmatpush.msrb.mxu3 %v230_v27  ;;  %v414_v11 = vld [vmem:[#allocation7 + $0x60] sm:$0xff]  ;;  %v412_v13 = vld [vmem:[#allocation7 + $0x50] sm:$0xff]  ;;  %v411_v14 = vld [vmem:[#allocation7 + $0x48] sm:$0xff] }
  0x47   :  { %328 = vmatpush.msrb.mxu0 %v181_v28  ;;  %347 = vmatpush.msrb.mxu1 %v198_v29  ;;  %v410_v15 = vld [vmem:[#allocation7 + $0x40] sm:$0xff]  ;;  %v409_v16 = vld [vmem:[#allocation7 + $0x38] sm:$0xff]  ;;  %v408_v17 = vld [vmem:[#allocation7 + $0x30] sm:$0xff] }
  0x48   :  { %369 = vmatpush.msrb.mxu2 %v212_v30  ;;  %388 = vmatpush.msrb.mxu3 %v229_v31  ;;  %v407_v18 = vld [vmem:[#allocation7 + $0x28] sm:$0xff]  ;;  %v406_v19 = vld [vmem:[#allocation7 + $0x20] sm:$0xff]  ;;  %v405_v20 = vld [vmem:[#allocation7 + $0x18] sm:$0xff] }
  0x49   :  { %329 = vmatpush.msrb.mxu0 %v180_v32  ;;  %348 = vmatpush.msrb.mxu1 %v197_v33  ;;  %v404_v21 = vld [vmem:[#allocation7 + $0x10] sm:$0xff]  ;;  %v403_v22 = vld [vmem:[#allocation7 + $0x8] sm:$0xff]  ;;  %v402_v23 = vld [vmem:[#allocation7] sm:$0xff] }
  0x4a   :  { %370 = vmatpush.msrb.mxu2 %v211_v34  ;;  %389 = vmatpush.msrb.mxu3 %v228_v35  ;;  %v563_v24 = vld [vmem:[#allocation8 + $0x3c0] sm:$0xff]  ;;  %v564_v25 = vld [vmem:[#allocation8 + $0x3c8] sm:$0xff]  ;;  %v565_v26 = vld [vmem:[#allocation8 + $0x3d0] sm:$0xff] }
  0x4b   :  { %330 = vmatpush.msrb.mxu0 %v179_v36  ;;  %349 = vmatpush.msrb.mxu1 %v196_v37  ;;  %v566_v27 = vld [vmem:[#allocation8 + $0x3d8] sm:$0xff]  ;;  %v555_v28 = vld [vmem:[#allocation8 + $0x380] sm:$0xff]  ;;  %v556_v29 = vld [vmem:[#allocation8 + $0x388] sm:$0xff] }
  0x4c   :  { %371 = vmatpush.msrb.mxu2 %v210_v38  ;;  %390 = vmatpush.msrb.mxu3 %v227_v39  ;;  %v557_v30 = vld [vmem:[#allocation8 + $0x390] sm:$0xff]  ;;  %v558_v31 = vld [vmem:[#allocation8 + $0x398] sm:$0xff]  ;;  %v547_v32 = vld [vmem:[#allocation8 + $0x340] sm:$0xff] }
  0x4d   :  { %331 = vmatpush.msrb.mxu0 %v178_v40  ;;  %350 = vmatpush.msrb.mxu1 %v195_v41  ;;  %v548_v33 = vld [vmem:[#allocation8 + $0x348] sm:$0xff]  ;;  %v549_v34 = vld [vmem:[#allocation8 + $0x350] sm:$0xff]  ;;  %v550_v35 = vld [vmem:[#allocation8 + $0x358] sm:$0xff] }
  0x4e   :  { %372 = vmatpush.msrb.mxu2 %v209_v42  ;;  %391 = vmatpush.msrb.mxu3 %v226_v43  ;;  %v539_v36 = vld [vmem:[#allocation8 + $0x300] sm:$0xff]  ;;  %v540_v37 = vld [vmem:[#allocation8 + $0x308] sm:$0xff]  ;;  %v541_v38 = vld [vmem:[#allocation8 + $0x310] sm:$0xff] }
  0x4f   :  { %297 = vmatmul.f32.vlgmr.msra.gmra.mxu2 %v103_v44  ;;  %332 = vmatpush.msrb.mxu0 %v177_v45  ;;  %v542_v39 = vld [vmem:[#allocation8 + $0x318] sm:$0xff]  ;;  %v531_v40 = vld [vmem:[#allocation8 + $0x2c0] sm:$0xff]  ;;  %v532_v41 = vld [vmem:[#allocation8 + $0x2c8] sm:$0xff] }
  0x50   :  { %351 = vmatpush.msrb.mxu1 %v194_v46  ;;  %373 = vmatpush.msrb.mxu2 %v208_v47  ;;  %v533_v42 = vld [vmem:[#allocation8 + $0x2d0] sm:$0xff]  ;;  %v534_v43 = vld [vmem:[#allocation8 + $0x2d8] sm:$0xff]  ;;  %v786_v44 = vld [vmem:[%s1016_s2] ss:$0 sm:$0xff] }
  0x51   :  { %392 = vmatpush.msrb.mxu3 %v225_v48  ;;  %257 = vmatmul.f32.vlgmr.msra.gmra.mxu0 %v101_v49  ;;  %v523_v45 = vld [vmem:[#allocation8 + $0x280] sm:$0xff]  ;;  %v524_v46 = vld [vmem:[#allocation8 + $0x288] sm:$0xff]  ;;  %v525_v47 = vld [vmem:[#allocation8 + $0x290] sm:$0xff] }
  0x52   :  { %317 = vmatmul.f32.vlgmr.msra.gmra.mxu3 %v104_v50  ;;  %333 = vmatpush.msrb.mxu0 %v176_v51  ;;  %v526_v48 = vld [vmem:[#allocation8 + $0x298] sm:$0xff]  ;;  %v515_v49 = vld [vmem:[#allocation8 + $0x240] sm:$0xff]  ;;  %v516_v50 = vld [vmem:[#allocation8 + $0x248] sm:$0xff] }
  0x53   :  { %352 = vmatpush.msrb.mxu1 %v193_v52  ;;  %374 = vmatpush.msrb.mxu2 %v207_v53  ;;  %v517_v52 = vld [vmem:[#allocation8 + $0x250] sm:$0xff]  ;;  %v518_v53 = vld [vmem:[#allocation8 + $0x258] sm:$0xff] }
  0x54   :  { %393 = vmatpush.msrb.mxu3 %v224_v54  ;;  %277 = vmatmul.f32.vlgmr.msra.gmra.mxu1 %v102_v55  ;;  %v507_v55 = vld [vmem:[#allocation8 + $0x200] sm:$0xff] }
  0x55   :  { %334 = vmatpush.msrb.mxu0 %v175_v56  ;;  %353 = vmatpush.msrb.mxu1 %v192_v57  ;;  %v508_v56 = vld [vmem:[#allocation8 + $0x208] sm:$0xff]  ;;  %v509_v57 = vld [vmem:[#allocation8 + $0x210] sm:$0xff] }
  0x56   :  { %375 = vmatpush.msrb.mxu2 %v206_v58  ;;  %394 = vmatpush.msrb.mxu3 %v223_v59  ;;  %v510_v58 = vld [vmem:[#allocation8 + $0x218] sm:$0xff] }
  0x57   :  { %335 = vmatpush.msrb.mxu0 %v174_v60  ;;  %354 = vmatpush.msrb.mxu1 %v191_v61  ;;  %v499_v60 = vld [vmem:[#allocation8 + $0x1c0] sm:$0xff]  ;;  %v500_v61 = vld [vmem:[#allocation8 + $0x1c8] sm:$0xff] }
  0x58   :  { %376 = vmatpush.msrb.mxu2 %v205_v62  ;;  %395 = vmatpush.msrb.mxu3 %v222_v63 }
  0x59   :  { %377 = vmatmul.f32.vlgmr.msrb.gmra.mxu2 %v107_v0  ;;  %336 = vmatpush.msrb.mxu0 %v173_v1  ;;  %v501_v0 = vld [vmem:[#allocation8 + $0x1d0] sm:$0xff]  ;;  %v502_v1 = vld [vmem:[#allocation8 + $0x1d8] sm:$0xff] }
  0x5a   :  { %355 = vmatpush.msrb.mxu1 %v190_v2  ;;  %396 = vmatpush.msrb.mxu3 %v221_v3  ;;  %v491_v2 = vld [vmem:[#allocation8 + $0x180] sm:$0xff]  ;;  %v492_v3 = vld [vmem:[#allocation8 + $0x188] sm:$0xff] }
  0x5b   :  { %337 = vmatmul.f32.vlgmr.msrb.gmra.mxu0 %v105_v4  ;;  %397 = vmatmul.f32.vlgmr.msrb.gmra.mxu3 %v108_v5  ;;  %v493_v5 = vld [vmem:[#allocation8 + $0x190] sm:$0xff] }
  0x5c   :  { %356 = vmatpush.msrb.mxu1 %v189_v6  ;;  %422 = vmatpush.msra.mxu0 %v417_v7  ;;  %v494_v6 = vld [vmem:[#allocation8 + $0x198] sm:$0xff] }
  0x5d   :  { %357 = vmatmul.f32.vlgmr.msrb.gmra.mxu1 %v106_v8  ;;  %609 = vmatpush.msra.mxu2 %v564_v25  ;;  %v483_v8 = vld [vmem:[#allocation8 + $0x140] sm:$0xff] }
  0x5e   :  { %423 = vmatpush.msra.mxu0 %v416_v9  ;;  %589 = vmatpush.msra.mxu1 %v563_v24  ;;  %v484_v9 = vld [vmem:[#allocation8 + $0x148] sm:$0xff]  ;;  %v459_v25 = vld [vmem:[#allocation8 + $0x80] sm:$0xff] }
  0x5f   :  { %629 = vmatpush.msra.mxu3 %v565_v26  ;;  %610 = vmatpush.msra.mxu2 %v556_v29  ;;  %v460_v26 = vld [vmem:[#allocation8 + $0x88] sm:$0xff]  ;;  %v462_v29 = vld [vmem:[#allocation8 + $0x98] sm:$0xff] }
  0x60   :  { %424 = vmatpush.msra.mxu0 %v415_v10  ;;  %590 = vmatpush.msra.mxu1 %v555_v28  ;;  %v461_v28 = vld [vmem:[#allocation8 + $0x90] sm:$0xff] }
  0x61   :  { %630 = vmatpush.msra.mxu3 %v557_v30  ;;  %611 = vmatpush.msra.mxu2 %v548_v33 }
  0x62   :  { %425 = vmatpush.msra.mxu0 %v414_v11  ;;  %591 = vmatpush.msra.mxu1 %v547_v32  ;;  %v485_v11 = vld [vmem:[#allocation8 + $0x150] sm:$0xff]  ;;  %v452_v32 = vld [vmem:[#allocation8 + $0x48] sm:$0xff] }
  0x63   :  { %631 = vmatpush.msra.mxu3 %v549_v34  ;;  %612 = vmatpush.msra.mxu2 %v540_v37  ;;  %v453_v34 = vld [vmem:[#allocation8 + $0x50] sm:$0xff]  ;;  %v443_v37 = vld [vmem:[#allocation8] sm:$0xff] }
  0x64   :  { %426 = vmatpush.msra.mxu0 %v413_v12  ;;  %592 = vmatpush.msra.mxu1 %v539_v36  ;;  %v486_v12 = vld [vmem:[#allocation8 + $0x158] sm:$0xff] }
  0x65   :  { %632 = vmatpush.msra.mxu3 %v541_v38  ;;  %613 = vmatpush.msra.mxu2 %v532_v41  ;;  %v444_v38 = vld [vmem:[#allocation8 + $0x8] sm:$0xff]  ;;  %v446_v41 = vld [vmem:[#allocation8 + $0x18] sm:$0xff] }
  0x66   :  { %427 = vmatpush.msra.mxu0 %v412_v13  ;;  %593 = vmatpush.msra.mxu1 %v531_v40  ;;  %v475_v13 = vld [vmem:[#allocation8 + $0x100] sm:$0xff] }
  0x67   :  { %633 = vmatpush.msra.mxu3 %v533_v42  ;;  %614 = vmatpush.msra.mxu2 %v524_v46  ;;  %v567_v42 = vld [vmem:[#allocation8 + $0x3e0] sm:$0xff] }
  0x68   :  { %428 = vmatpush.msra.mxu0 %v411_v14  ;;  %594 = vmatpush.msra.mxu1 %v523_v45  ;;  %v476_v14 = vld [vmem:[#allocation8 + $0x108] sm:$0xff]  ;;  %v570_v45 = vld [vmem:[#allocation8 + $0x3f8] sm:$0xff]  ;;  %v559_v46 = vld [vmem:[#allocation8 + $0x3a0] sm:$0xff] }
  0x69   :  { %634 = vmatpush.msra.mxu3 %v525_v47  ;;  %615 = vmatpush.msra.mxu2 %v516_v50  ;;  %v560_v47 = vld [vmem:[#allocation8 + $0x3a8] sm:$0xff]  ;;  %v551_v50 = vld [vmem:[#allocation8 + $0x360] sm:$0xff] }
  0x6a   :  { %429 = vmatpush.msra.mxu0 %v410_v15  ;;  %595 = vmatpush.msra.mxu1 %v515_v49  ;;  %v562_v49 = vld [vmem:[#allocation8 + $0x3b8] sm:$0xff] }
  0x6b   :  { %635 = vmatpush.msra.mxu3 %v517_v52  ;;  %616 = vmatpush.msra.mxu2 %v508_v56  ;;  %v553_v52 = vld [vmem:[#allocation8 + $0x370] sm:$0xff] }
  0x6c   :  { %430 = vmatpush.msra.mxu0 %v409_v16  ;;  %596 = vmatpush.msra.mxu1 %v507_v55  ;;  %v477_v16 = vld [vmem:[#allocation8 + $0x110] sm:$0xff]  ;;  %v544_v55 = vld [vmem:[#allocation8 + $0x328] sm:$0xff] }
  0x6d   :  { %636 = vmatpush.msra.mxu3 %v509_v57  ;;  %617 = vmatpush.msra.mxu2 %v500_v61  ;;  %v545_v56 = vld [vmem:[#allocation8 + $0x330] sm:$0xff]  ;;  %v546_v57 = vld [vmem:[#allocation8 + $0x338] sm:$0xff] }
  0x6e   :  { %431 = vmatpush.msra.mxu0 %v408_v17  ;;  %597 = vmatpush.msra.mxu1 %v499_v60  ;;  %v478_v17 = vld [vmem:[#allocation8 + $0x118] sm:$0xff]  ;;  %v537_v60 = vld [vmem:[#allocation8 + $0x2f0] sm:$0xff] }
  0x6f   :  { %637 = vmatpush.msra.mxu3 %v501_v0  ;;  %618 = vmatpush.msra.mxu2 %v492_v3  ;;  %v538_v61 = vld [vmem:[#allocation8 + $0x2f8] sm:$0xff]  ;;  %v529_v0 = vld [vmem:[#allocation8 + $0x2b0] sm:$0xff]  ;;  %v520_v3 = vld [vmem:[#allocation8 + $0x268] sm:$0xff] }
  0x70   :  { %432 = vmatpush.msra.mxu0 %v407_v18  ;;  %598 = vmatpush.msra.mxu1 %v491_v2  ;;  %v519_v2 = vld [vmem:[#allocation8 + $0x260] sm:$0xff] }
  0x71   :  { %638 = vmatpush.msra.mxu3 %v493_v5  ;;  %619 = vmatpush.msra.mxu2 %v484_v9  ;;  %v522_v5 = vld [vmem:[#allocation8 + $0x278] sm:$0xff] }
  0x72   :  { %433 = vmatpush.msra.mxu0 %v406_v19  ;;  %599 = vmatpush.msra.mxu1 %v483_v8  ;;  %v467_v19 = vld [vmem:[#allocation8 + $0xc0] sm:$0xff]  ;;  %v513_v8 = vld [vmem:[#allocation8 + $0x230] sm:$0xff]  ;;  %v514_v9 = vld [vmem:[#allocation8 + $0x238] sm:$0xff] }
  0x73   :  { %639 = vmatpush.msra.mxu3 %v485_v11  ;;  %620 = vmatpush.msra.mxu2 %v476_v14  ;;  %v504_v11 = vld [vmem:[#allocation8 + $0x1e8] sm:$0xff]  ;;  %v495_v14 = vld [vmem:[#allocation8 + $0x1a0] sm:$0xff] }
  0x74   :  { %434 = vmatpush.msra.mxu0 %v405_v20  ;;  %v468_v20 = vld [vmem:[#allocation8 + $0xc8] sm:$0xff]  ;;  %600 = vmatpush.msra.mxu1 %v475_v13  ;;  %v506_v13 = vld [vmem:[#allocation8 + $0x1f8] sm:$0xff] }
  0x75   :  { %640 = vmatpush.msra.mxu3 %v477_v16  ;;  %621 = vmatpush.msra.mxu2 %v468_v20  ;;  %v497_v16 = vld [vmem:[#allocation8 + $0x1b0] sm:$0xff] }
  0x76   :  { %435 = vmatpush.msra.mxu0 %v404_v21  ;;  %601 = vmatpush.msra.mxu1 %v467_v19  ;;  %v488_v19 = vld [vmem:[#allocation8 + $0x168] sm:$0xff]  ;;  %v489_v20 = vld [vmem:[#allocation8 + $0x170] sm:$0xff] }
  0x77   :  { %622 = vmatpush.msra.mxu2 %v460_v26  ;;  %v471_v26 = vld [vmem:[#allocation8 + $0xe0] sm:$0xff] }
  0x78   :  { %436 = vmatpush.msra.mxu0 %v403_v22  ;;  %v469_v22 = vld [vmem:[#allocation8 + $0xd0] sm:$0xff]  ;;  %602 = vmatpush.msra.mxu1 %v459_v25  ;;  %v482_v25 = vld [vmem:[#allocation8 + $0x138] sm:$0xff] }
  0x79   :  { %641 = vmatpush.msra.mxu3 %v469_v22  ;;  %623 = vmatpush.msra.mxu2 %v452_v32  ;;  %v479_v22 = vld [vmem:[#allocation8 + $0x120] sm:$0xff]  ;;  %v465_v32 = vld [vmem:[#allocation8 + $0xb0] sm:$0xff] }
  0x7a   :  { %437 = vmatpush.msra.mxu0 %v402_v23  ;;  %v470_v23 = vld [vmem:[#allocation8 + $0xd8] sm:$0xff] }
  0x7b   :  { %642 = vmatpush.msra.mxu3 %v461_v28  ;;  %624 = vmatpush.msra.mxu2 %v444_v38  ;;  %v473_v28 = vld [vmem:[#allocation8 + $0xf0] sm:$0xff]  ;;  %v447_v38 = vld [vmem:[#allocation8 + $0x20] sm:$0xff] }
  0x7c   :  { %649 = vmatpush.msrb.mxu0 %v566_v27 }
  0x7d   :  { %643 = vmatpush.msra.mxu3 %v453_v34  ;;  %v455_v34 = vld [vmem:[#allocation8 + $0x60] sm:$0xff] }
  0x7e   :  { %650 = vmatpush.msrb.mxu0 %v558_v31  ;;  %v451_v31 = vld [vmem:[#allocation8 + $0x40] sm:$0xff] }
  0x7f   :  { %603 = vmatpush.msra.mxu1 %v451_v31  ;;  %v464_v31 = vld [vmem:[#allocation8 + $0xa8] sm:$0xff] }
  0x80   :  { %651 = vmatpush.msrb.mxu0 %v550_v35  ;;  %v454_v35 = vld [vmem:[#allocation8 + $0x58] sm:$0xff] }
  0x81   :  { %604 = vmatpush.msra.mxu1 %v443_v37  ;;  %v458_v37 = vld [vmem:[#allocation8 + $0x78] sm:$0xff] }
  0x82   :  { %652 = vmatpush.msrb.mxu0 %v542_v39  ;;  %v445_v39 = vld [vmem:[#allocation8 + $0x10] sm:$0xff] }
  0x83   :  { %644 = vmatpush.msra.mxu3 %v445_v39  ;;  %669 = vmatpush.msrb.mxu1 %v567_v42  ;;  %v448_v39 = vld [vmem:[#allocation8 + $0x28] sm:$0xff]  ;;  %v787_v42 = vld [vmem:[%s1018_s4] ss:$0 sm:$0xff]  ;;  %s949_s4 = smov [#allocation11]  }
  0x84   :  { %653 = vmatpush.msrb.mxu0 %v534_v43  ;;  %v568_v43 = vld [vmem:[#allocation8 + $0x3e8] sm:$0xff]  ;;  %s762_s28 = sshll.u32 %s949_s4, 4  ;;  %s763_s28 = int_to_ptr.vmem [resolvable:$true] %s762_s28 }
  0x85   :  { %689 = vmatpush.msrb.mxu2 %v568_v43  ;;  %670 = vmatpush.msrb.mxu1 %v559_v46  ;;  %v571_v46 = vld [vmem:[#allocation10] sm:$0xff] }
  0x86   :  { %654 = vmatpush.msrb.mxu0 %v526_v48  ;;  %v561_v48 = vld [vmem:[#allocation8 + $0x3b0] sm:$0xff] }
  0x87   :  { %690 = vmatpush.msrb.mxu2 %v560_v47  ;;  %671 = vmatpush.msrb.mxu1 %v551_v50  ;;  %v573_v47 = vperm.slane %v571_v46, 0 }
  0x88   :  { %655 = vmatpush.msrb.mxu0 %v518_v53  ;;  %v554_v53 = vld [vmem:[#allocation8 + $0x378] sm:$0xff] }
  0x8a   :  { %656 = vmatpush.msrb.mxu0 %v510_v58  ;;  %v535_v58 = vld [vmem:[#allocation8 + $0x2e0] sm:$0xff] }
  0x8c   :  { %657 = vmatpush.msrb.mxu0 %v502_v1  ;;  %v530_v1 = vld [vmem:[#allocation8 + $0x2b8] sm:$0xff] }
  0x8e   :  { %658 = vmatpush.msrb.mxu0 %v494_v6  ;;  %v511_v6 = vld [vmem:[#allocation8 + $0x220] sm:$0xff] }
  0x90   :  { %659 = vmatpush.msrb.mxu0 %v486_v12  ;;  %v505_v12 = vld [vmem:[#allocation8 + $0x1f0] sm:$0xff] }
  0x92   :  { %660 = vmatpush.msrb.mxu0 %v478_v17  ;;  %v498_v17 = vld [vmem:[#allocation8 + $0x1b8] sm:$0xff] }
  0x94   :  { %661 = vmatpush.msrb.mxu0 %v470_v23  ;;  %v480_v23 = vld [vmem:[#allocation8 + $0x128] sm:$0xff] }
  0x96   :  { %662 = vmatpush.msrb.mxu0 %v462_v29  ;;  %v474_v29 = vld [vmem:[#allocation8 + $0xf8] sm:$0xff] }
  0x98   :  { %663 = vmatpush.msrb.mxu0 %v454_v35  ;;  %v456_v35 = vld [vmem:[#allocation8 + $0x68] sm:$0xff] }
  0x9a   :  { %664 = vmatpush.msrb.mxu0 %v446_v41  ;;  %v450_v41 = vld [vmem:[#allocation8 + $0x38] sm:$0xff] }
  0xce   :  { %v258_v51 = vpop.f32.mrf.mxu0 }
  0xcf   :  { %v259_v54 = vadd.f32 %v786_v44, %v258_v51  ;;  %v569_v44 = vld [vmem:[#allocation8 + $0x3f0] sm:$0xff]  ;;  %v552_v51 = vld [vmem:[#allocation8 + $0x368] sm:$0xff] }
  0xd0   :  { %709 = vmatpush.msrb.mxu3 %v569_v44  ;;  %691 = vmatpush.msrb.mxu2 %v552_v51 }
  0xd1   :  { %v278_v59 = vpop.f32.mrf.mxu1 }
  0xd2   :  { %v279_v62 = vadd.f32 %v278_v59, %v259_v54  ;;  %v298_v63 = vpop.f32.mrf.mxu2  ;;  %710 = vmatpush.msrb.mxu3 %v561_v48  ;;  %v543_v54 = vld [vmem:[#allocation8 + $0x320] sm:$0xff]  ;;  %v536_v59 = vld [vmem:[#allocation8 + $0x2e8] sm:$0xff]  ;;  %692 = vmatpush.msrb.mxu2 %v544_v55  ;;  %v576_v48 = vperm.slane %v571_v46, 3  ;;  %v577_v55 = vperm.slane %v571_v46, 4 }
  0xd3   :  { %672 = vmatpush.msrb.mxu1 %v543_v54  ;;  %v575_v54 = vperm.slane %v571_v46, 2 }
  0xd4   :  { %v299_v4 = vadd.f32 %v298_v63, %v279_v62  ;;  %711 = vmatpush.msrb.mxu3 %v553_v52  ;;  %v527_v62 = vld [vmem:[#allocation8 + $0x2a0] sm:$0xff]  ;;  %v528_v63 = vld [vmem:[#allocation8 + $0x2a8] sm:$0xff]  ;;  %693 = vmatpush.msrb.mxu2 %v536_v59 }
  0xd5   :  { %v318_v7 = vpop.f32.mrf.mxu3  ;;  %673 = vmatpush.msrb.mxu1 %v535_v58 }
  0xd6   :  { %v319_v10 = vadd.f32 %v318_v7, %v299_v4  ;;  %712 = vmatpush.msrb.mxu3 %v545_v56  ;;  %v521_v4 = vld [vmem:[#allocation8 + $0x270] sm:$0xff]  ;;  %694 = vmatpush.msrb.mxu2 %v528_v63  ;;  %v512_v7 = vld [vmem:[#allocation8 + $0x228] sm:$0xff] }
  0xd7   :  { %674 = vmatpush.msrb.mxu1 %v527_v62 }
  0xd8   :  { %v338_v15 = vpop.f32.mrf.mxu0  ;;  %713 = vmatpush.msrb.mxu3 %v537_v60  ;;  %695 = vmatpush.msrb.mxu2 %v520_v3 }
  0xd9   :  { %v339_v18 = vadd.f32 %v338_v15, %v319_v10  ;;  %675 = vmatpush.msrb.mxu1 %v519_v2  ;;  %v503_v10 = vld [vmem:[#allocation8 + $0x1e0] sm:$0xff]  ;;  %v496_v15 = vld [vmem:[#allocation8 + $0x1a8] sm:$0xff]  ;;  %v579_v2 = vperm.slane %v571_v46, 6 }
  0xda   :  { %v358_v21 = vpop.f32.mrf.mxu1  ;;  %714 = vmatpush.msrb.mxu3 %v529_v0  ;;  %696 = vmatpush.msrb.mxu2 %v512_v7 }
  0xdb   :  { %v359_v24 = vadd.f32 %v358_v21, %v339_v18  ;;  %676 = vmatpush.msrb.mxu1 %v511_v6  ;;  %v487_v18 = vld [vmem:[#allocation8 + $0x160] sm:$0xff]  ;;  %v490_v21 = vld [vmem:[#allocation8 + $0x178] sm:$0xff] }
  0xdc   :  { %v378_v27 = vpop.f32.mrf.mxu2  ;;  %715 = vmatpush.msrb.mxu3 %v521_v4  ;;  %697 = vmatpush.msrb.mxu2 %v504_v11 }
  0xdd   :  { %v379_v30 = vadd.f32 %v378_v27, %v359_v24  ;;  %677 = vmatpush.msrb.mxu1 %v503_v10  ;;  %v481_v24 = vld [vmem:[#allocation8 + $0x130] sm:$0xff]  ;;  %v472_v27 = vld [vmem:[#allocation8 + $0xe8] sm:$0xff] }
  0xde   :  { %v398_v33 = vpop.f32.mrf.mxu3  ;;  %716 = vmatpush.msrb.mxu3 %v513_v8  ;;  %698 = vmatpush.msrb.mxu2 %v496_v15 }
  0xdf   :  { %v399_v36 = vadd.f32 %v398_v33, %v379_v30  ;;  %678 = vmatpush.msrb.mxu1 %v495_v14  ;;  %v463_v30 = vld [vmem:[#allocation8 + $0xa0] sm:$0xff]  ;;  %v466_v33 = vld [vmem:[#allocation8 + $0xb8] sm:$0xff] }
  0xe0   :  { %717 = vmatpush.msrb.mxu3 %v505_v12  ;;  %699 = vmatpush.msrb.mxu2 %v488_v19 }
  0xe1   :  { %v401_v40 = vmax.f32 %v399_v36, 0.0  ;;  %679 = vmatpush.msrb.mxu1 %v487_v18  ;;  %v457_v36 = vld [vmem:[#allocation8 + $0x70] sm:$0xff] }
  0xe2   :  { %718 = vmatpush.msrb.mxu3 %v497_v16  ;;  %700 = vmatpush.msrb.mxu2 %v480_v23 }
  0xe3   :  { %438 = vmatmul.f32.vlgmr.msra.gmra.mxu0 %v401_v40  ;;  %680 = vmatpush.msrb.mxu1 %v479_v22  ;;  %v449_v40 = vld [vmem:[#allocation8 + $0x30] sm:$0xff] }
  0xe4   :  { %729 = vmatpush.msra.mxu0 %v570_v45  ;;  %719 = vmatpush.msrb.mxu3 %v489_v20 }
  0xe5   :  { %681 = vmatpush.msrb.mxu1 %v471_v26  ;;  %701 = vmatpush.msrb.mxu2 %v472_v27 }
  0xe6   :  { %730 = vmatpush.msra.mxu0 %v562_v49  ;;  %720 = vmatpush.msrb.mxu3 %v481_v24 }
  0xe7   :  { %682 = vmatpush.msrb.mxu1 %v463_v30  ;;  %702 = vmatpush.msrb.mxu2 %v464_v31 }
  0xe8   :  { %731 = vmatpush.msra.mxu0 %v554_v53  ;;  %721 = vmatpush.msrb.mxu3 %v473_v28  ;;  %v574_v53 = vperm.slane %v571_v46, 1 }
  0xe9   :  { %683 = vmatpush.msrb.mxu1 %v455_v34  ;;  %703 = vmatpush.msrb.mxu2 %v456_v35 }
  0xea   :  { %732 = vmatpush.msra.mxu0 %v546_v57  ;;  %722 = vmatpush.msrb.mxu3 %v465_v32  ;;  %v580_v57 = vperm.slane %v571_v46, 7 }
  0xeb   :  { %684 = vmatpush.msrb.mxu1 %v447_v38  ;;  %704 = vmatpush.msrb.mxu2 %v448_v39 }
  0xec   :  { %733 = vmatpush.msra.mxu0 %v538_v61  ;;  %723 = vmatpush.msrb.mxu3 %v457_v36 }
  0xee   :  { %734 = vmatpush.msra.mxu0 %v530_v1  ;;  %724 = vmatpush.msrb.mxu3 %v449_v40  ;;  %v578_v1 = vperm.slane %v571_v46, 5 }
  0xf0   :  { %735 = vmatpush.msra.mxu0 %v522_v5 }
  0xf2   :  { %736 = vmatpush.msra.mxu0 %v514_v9 }
  0xf4   :  { %737 = vmatpush.msra.mxu0 %v506_v13 }
  0xf6   :  { %738 = vmatpush.msra.mxu0 %v498_v17 }
  0xf8   :  { %739 = vmatpush.msra.mxu0 %v490_v21 }
  0xfa   :  { %740 = vmatpush.msra.mxu0 %v482_v25 }
  0xfc   :  { %741 = vmatpush.msra.mxu0 %v474_v29 }
  0xfe   :  { %742 = vmatpush.msra.mxu0 %v466_v33 }
 0x100   :  { %743 = vmatpush.msra.mxu0 %v458_v37 }
 0x102   :  { %744 = vmatpush.msra.mxu0 %v450_v41 }
 0x160   :  { %v439_v43 = vpop.f32.mrf.mxu0 }
 0x161   :  { %v440_v44 = vadd.f32 %v787_v42, %v439_v43 }
 0x163   :  { %v442_v45 = vmax.f32 %v440_v44, 0.0 }
 0x165   :  { %605 = vmatmul.f32.vlgmr.msra.gmra.mxu1 %v442_v45  ;;  %625 = vmatmul.f32.vlgmr.msra.gmra.mxu2 %v442_v45 }
 0x166   :  { %645 = vmatmul.f32.vlgmr.msra.gmra.mxu3 %v442_v45  ;;  %665 = vmatmul.f32.vlgmr.msrb.gmra.mxu0 %v442_v45 }
 0x16d   :  { %685 = vmatmul.f32.vlgmr.msrb.gmra.mxu1 %v442_v45  ;;  %705 = vmatmul.f32.vlgmr.msrb.gmra.mxu2 %v442_v45 }
 0x16e   :  { %725 = vmatmul.f32.vlgmr.msrb.gmra.mxu3 %v442_v45  ;;  %745 = vmatmul.f32.vlgmr.msra.gmra.mxu0 %v442_v45 }
 0x1e2   :  { %v606_v49 = vpop.f32.mrf.mxu1 }
 0x1e3   :  { %v607_v50 = vadd.f32 %v606_v49, %v573_v47  ;;  %v666_v51 = vpop.f32.mrf.mxu0 }
 0x1e4   :  { %v667_v52 = vadd.f32 %v666_v51, %v576_v48 }
 0x1e5   :  { %749 = vst [vmem:[#allocation11] sm:$0xff] %v607_v50 }
 0x1e6   :  { %752 = vst [vmem:[#allocation11 + $0x18] sm:$0xff] %v667_v52 }
 0x1e8   :  { %v626_v56 = vpop.f32.mrf.mxu2 }
 0x1e9   :  { %v627_v58 = vadd.f32 %v626_v56, %v574_v53  ;;  %v646_v59 = vpop.f32.mrf.mxu3 }
 0x1ea   :  { %v647_v60 = vadd.f32 %v646_v59, %v575_v54  ;;  %v686_v61 = vpop.f32.mrf.mxu1 }
 0x1eb   :  { %750 = vst [vmem:[#allocation11 + $0x8] sm:$0xff] %v627_v58  ;;  %v687_v62 = vadd.f32 %v686_v61, %v577_v55  ;;  %v746_v63 = vpop.f32.mrf.mxu0 }
 0x1ec   :  { %751 = vst [vmem:[#allocation11 + $0x10] sm:$0xff] %v647_v60  ;;  %v747_v0 = vadd.f32 %v746_v63, %v580_v57 }
 0x1ed   :  { %753 = vst [vmem:[#allocation11 + $0x20] sm:$0xff] %v687_v62 }
 0x1ee   :  { %756 = vst [vmem:[#allocation11 + $0x38] sm:$0xff] %v747_v0 }
 0x1f0   :  { %v706_v3 = vpop.f32.mrf.mxu2 }
 0x1f1   :  { %v707_v4 = vadd.f32 %v706_v3, %v578_v1  ;;  %v726_v5 = vpop.f32.mrf.mxu3 }
 0x1f2   :  { %v727_v6 = vadd.f32 %v726_v5, %v579_v2 }
 0x1f3   :  { %754 = vst [vmem:[#allocation11 + $0x28] sm:$0xff] %v707_v4 }
 0x1f4   :  { %755 = vst [vmem:[#allocation11 + $0x30] sm:$0xff] %v727_v6 }
 0x1f5   :  { %767 = dma.vmem_to_hbm [thread:$0]  %s763_s28, 1024, %s765_s8, [#allocation4]  }
 0x1f6   :  { %938 = dma.done.wait [#allocation4], 1024  }
 0x1f7   :  { %939 = vsyncadd [#allocation4], 4294966272 }
 0x1f8   :  { %772 = vsyncpa [#allocation3], 1 }
 0x1f9   :  { %773 = vsyncpa [#allocation6], 1 }
 0x1fa   :  { %774 = vsyncpa [#allocation9], 1 }
 0x1fb   :  { %775 = vsyncpa [#allocation4], 1 }

</bundles_post_ra>
